<compile_context>
chip_gen: v7x
topology: tpu7x:2x2x1
jax: 0.10.0
libtpu: 0.0.40
codegen_flags: <defaults>
</compile_context>

<pallas_src>
import functools

import jax
import jax.numpy as jnp
import numpy as np
from jax.experimental import pallas as pl
from jax.experimental.pallas import tpu as pltpu

# --- small, module-consistent dimensions ---------------------------------
N = 2    # batch
M = 8    # number of part masks
D = 32   # feature depth (channels)
H = 16   # spatial height
W = 16   # spatial width


def _mask_weighted_pool_kernel(mask_ref, feat_ref, o_ref, *, inv_hw):
    # mask_ref: (1, M, HW), feat_ref: (1, HW, TD), o_ref: (1, M, TD)
    mask = mask_ref[0]   # (M, HW)
    feat = feat_ref[0]   # (HW, TD): contraction axis on sublanes -> no RHS transpose
    acc = jnp.dot(mask, feat, preferred_element_type=jnp.float32)  # (M, TD), f32 acc
    o_ref[0] = (acc * inv_hw).astype(o_ref.dtype)


def global_mask_weighted_pooling_head(features, part_masks, *, tile_d=512):
    """features: (N, D, H, W), part_masks: (N, M, H, W) -> (N, M, D) in features.dtype.

    Matches GlobalMaskWeightedPoolingHead(normalization='identity') with
    AdaptiveAvgPool2d((1, 1)) global pooling. f32 accumulation on the MXU.
    """
    n, d, h, w = features.shape
    n2, m, h2, w2 = part_masks.shape
    assert (n, h, w) == (n2, h2, w2)
    hw = h * w
    td = min(d, tile_d)

    # Layout plumbing only (fuses with the producer under jit): channels-last,
    # flattened spatial axis so the kernel RHS is already (HW, D).
    feat_nshd = jnp.moveaxis(features, 1, -1).reshape(n, hw, d)   # (N, HW, D)
    mask_flat = part_masks.reshape(n, m, hw)                      # (N, M, HW)
    out_dtype = features.dtype

    # TODO(synk): normalization != 'identity' (BatchNorm1d/2d/3d branches of the
    # PyTorch module) is not implemented; the constructor default is implemented.
    # TODO(synk): self.global_pooling is undefined on this base class in PyTorch;
    # concrete subclasses use AdaptiveAvgPool2d((1,1)), which is what this does.

    grid = (n, pl.cdiv(d, td))

    # Double-buffered block footprint + headroom for the scoped-VMEM limit.
    block_bytes = (m * hw * mask_flat.dtype.itemsize
                   + hw * td * feat_nshd.dtype.itemsize
                   + m * td * jnp.dtype(out_dtype).itemsize)
    vmem_limit = int(min(96 * 1024 * 1024, max(4 * 1024 * 1024, 3 * block_bytes)))

    cost = pl.CostEstimate(
        flops=2 * n * m * d * hw,
        transcendentals=0,
        bytes_accessed=int(mask_flat.size * mask_flat.dtype.itemsize
                           + feat_nshd.size * feat_nshd.dtype.itemsize
                           + n * m * d * jnp.dtype(out_dtype).itemsize),
    )

    kernel = functools.partial(_mask_weighted_pool_kernel, inv_hw=1.0 / float(hw))
    return pl.pallas_call(
        kernel,
        out_shape=jax.ShapeDtypeStruct((n, m, d), out_dtype),
        grid_spec=pltpu.PrefetchScalarGridSpec(
            num_scalar_prefetch=0,
            grid=grid,
            in_specs=[
                pl.BlockSpec((1, m, hw), lambda b, j: (b, 0, 0)),   # part masks
                pl.BlockSpec((1, hw, td), lambda b, j: (b, 0, j)),  # features (channels-last)
            ],
            out_specs=pl.BlockSpec((1, m, td), lambda b, j: (b, 0, j)),
        ),
        compiler_params=pltpu.CompilerParams(
            dimension_semantics=("parallel", "parallel"),
            vmem_limit_bytes=vmem_limit,
        ),
        cost_estimate=cost,
    )(mask_flat, feat_nshd)


# --- plain-JAX reference mirroring the PyTorch forward ---------------------
def reference_forward(features, part_masks):
    pm = part_masks[:, :, None, :, :]          # (N, M, 1, H, W)
    ft = features[:, None, :, :, :]            # (N, 1, D, H, W)
    parts = pm * ft                            # (N, M, D, H, W)
    n, m = parts.shape[:2]
    parts = parts.reshape(n * m, *parts.shape[2:])   # flatten(0, 1)
    # normalization = nn.Identity()
    pooled = jnp.mean(parts, axis=(-2, -1))    # AdaptiveAvgPool2d((1, 1))
    return pooled.reshape(n, m, -1)            # view(N, M, -1)


if __name__ == "__main__":
    key = jax.random.PRNGKey(0)
    kf, km = jax.random.split(key)
    features = jax.random.normal(kf, (N, D, H, W), jnp.float32)
    # Soft part masks (sum to 1 over the part axis, as produced upstream).
    part_masks = jax.nn.softmax(
        jax.random.normal(km, (N, M, H, W), jnp.float32), axis=1)

    # f32 path
    out = jax.block_until_ready(global_mask_weighted_pooling_head(features, part_masks))
    ref = jax.block_until_ready(reference_forward(features, part_masks))
    assert out.shape == (N, M, D)
    np.testing.assert_allclose(np.asarray(out), np.asarray(ref), rtol=2e-3, atol=1e-3)

    # bf16-input path (halved DMA bytes, bf16-native MXU; f32 accumulation in-kernel)
    features_bf16 = features.astype(jnp.bfloat16)
    part_masks_bf16 = part_masks.astype(jnp.bfloat16)
    out_bf16 = jax.block_until_ready(
        global_mask_weighted_pooling_head(features_bf16, part_masks_bf16))
    ref_bf16 = reference_forward(features_bf16.astype(jnp.float32),
                                 part_masks_bf16.astype(jnp.float32))
    np.testing.assert_allclose(np.asarray(out_bf16.astype(jnp.float32)),
                               np.asarray(ref_bf16), rtol=2e-2, atol=2e-3)

    print("KERNEL_OK")
</pallas_src>

<mosaic_0001>
module attributes {stable_mosaic.version = 11 : i64} {
  func.func @_mask_weighted_pool_kernel(%arg0: i32, %arg1: i32, %arg2: memref<1x8x256xf32, #tpu.memory_space<vmem>>, %arg3: memref<1x256x32xf32, #tpu.memory_space<vmem>>, %arg4: memref<1x8x32xf32, #tpu.memory_space<vmem>>) attributes {dimension_semantics = [#tpu.dimension_semantics<parallel>, #tpu.dimension_semantics<parallel>], iteration_bounds = array<i64: 2, 1>, scalar_prefetch = 0 : i64, scratch_operands = 0 : i64, tpu.core_type = #tpu.core_type<tc>, window_params = [{transform_indices = @transform_0, window_bounds = array<i64: 1, 8, 256>}, {transform_indices = @transform_1, window_bounds = array<i64: 1, 256, 32>}, {transform_indices = @transform_2, window_bounds = array<i64: 1, 8, 32>}]} {
    %c0 = arith.constant 0 : index
    %c0_0 = arith.constant 0 : index
    %c0_1 = arith.constant 0 : index
    %0 = vector.load %arg2[%c0, %c0_0, %c0_1] : memref<1x8x256xf32, #tpu.memory_space<vmem>>, vector<1x8x256xf32>
    %1 = vector.shape_cast %0 : vector<1x8x256xf32> to vector<8x256xf32>
    %c0_2 = arith.constant 0 : index
    %c0_3 = arith.constant 0 : index
    %c0_4 = arith.constant 0 : index
    %2 = vector.load %arg3[%c0_2, %c0_3, %c0_4] : memref<1x256x32xf32, #tpu.memory_space<vmem>>, vector<1x256x32xf32>
    %3 = vector.shape_cast %2 : vector<1x256x32xf32> to vector<256x32xf32>
    %cst = arith.constant dense<0.000000e+00> : vector<8x32xf32>
    %4 = tpu.matmul %1, %3, %cst {dimension_numbers = #tpu.dot_dimension_numbers<[1], [0], [0], [1], [0, 0, 1, 1], [], []>} : vector<8x256xf32>, vector<256x32xf32>, vector<8x32xf32> -> vector<8x32xf32>
    %cst_5 = arith.constant 3.906250e-03 : f32
    %5 = vector.broadcast %cst_5 : f32 to vector<8x32xf32>
    %6 = arith.mulf %4, %5 : vector<8x32xf32>
    %c0_6 = arith.constant 0 : index
    %c0_7 = arith.constant 0 : index
    %c0_8 = arith.constant 0 : index
    %7 = vector.load %arg4[%c0_6, %c0_7, %c0_8] : memref<1x8x32xf32, #tpu.memory_space<vmem>>, vector<1x8x32xf32>
    %8 = vector.shape_cast %7 : vector<1x8x32xf32> to vector<8x32xf32>
    %9 = vector.shape_cast %6 : vector<8x32xf32> to vector<1x8x32xf32>
    tpu.vector_store %arg4[%c0_6, %c0_7, %c0_8], %9 {strides = array<i32>} : memref<1x8x32xf32, #tpu.memory_space<vmem>>, vector<1x8x32xf32>,
    return
  }
  func.func @transform_0(%arg0: i32, %arg1: i32) -> (i32, i32, i32) {
    %c0_i32 = arith.constant 0 : i32
    %c0_i32_0 = arith.constant 0 : i32
    %c0_i32_1 = arith.constant 0 : i32
    return %arg0, %c0_i32, %c0_i32_0 : i32, i32, i32
  }
  func.func @transform_1(%arg0: i32, %arg1: i32) -> (i32, i32, i32) {
    %c0_i32 = arith.constant 0 : i32
    %c0_i32_0 = arith.constant 0 : i32
    return %arg0, %c0_i32, %arg1 : i32, i32, i32
  }
  func.func @transform_2(%arg0: i32, %arg1: i32) -> (i32, i32, i32) {
    %c0_i32 = arith.constant 0 : i32
    %c0_i32_0 = arith.constant 0 : i32
    return %arg0, %c0_i32, %arg1 : i32, i32, i32
  }
}

</mosaic_0001>

<bundles_post_ra>
// kernel: tpu_custom_call.1
= control target key start
LH: loop header
LB: loop body
LE: loop exit
PB: predicated region body
PF: predicated region fallthrough
CT: control target
= control target key end

     0   :  { %7 = vsyncpa [#allocation3], 0  ;;  %s782_s0 = inlined_call_operand.vmem [shape: f32[2,8,256], index: 0, kind: input, shape index: {}]   ;;  %s783_s1 = inlined_call_operand.vmem [shape: f32[2,256,32], index: 1, kind: input, shape index: {}]   ;;  %s784_s2 = inlined_call_operand.hbm [shape: f32[2,8,32], index: 2, kind: output, shape index: {}]  }
   0x1   :  { %9 = vsyncpa [#allocation3 + $0x1], 0  ;;  %s629_s9 = smov 0   ;;  %s631_s10 = smov 0  }
   0x2   :  { %s633_s11 = smov 0   ;;  %s635_s12 = smov 0  }
   0x3   :  { %s637_s13 = smov 0   ;;  %s639_s14 = smov 0  }
   0x4 LB: > { %s395_s15 = sadd.s32 4294967295, %s611_s14   ;;  %s396_s16 = sadd.s32 4294967294, %s611_s14   ;;  %s611_s14 = sphi %s639_s14, %s15_s14   ;;  %s607_s13 = sphi %s637_s13, %s791_s13   ;;  %s603_s12 = sphi %s635_s12, %s790_s12   ;;  %s599_s11 = sphi %s633_s11, %s789_s11   ;;  %s595_s10 = sphi %s631_s10, %s788_s10   ;;  %s591_s9 = sphi %s629_s9, %s787_s9  }
   0x5   : > { %s27_s17 = sadd.s32 1, %s607_s13  ;;  %s90_s18 = sadd.s32 1, %s599_s11 }
   0x6   : > { %p29_p0 = scmp.ge.s32.totalorder %s27_s17, 2  ;;  %p100_p1 = scmp.ne.s32.totalorder %s599_s11, %s595_s10 }
   0x7   : > { %p101_p2 = scmp.eq.s32.totalorder %s395_s15, 1  ;;  %p106_p3 = scmp.ne.s32.totalorder %s595_s10, %s591_s9 }
   0x8   : > { %s793_s17 = smov (%p29_p0, %s27_s17), 0  ;;  %p107_p5 = scmp.eq.s32.totalorder %s396_s16, 1 }
   0x9   : > { %p669_p4 = por %p101_p2, %p100_p1  ;;  %s85_s20 = ssub.s32 %s607_s13, %s793_s17 }
   0xa   : > { %p399_p6 = scmp.ge.s32.totalorder %s611_s14, 1  ;;  %p88_p7 = scmp.eq.s32.totalorder %s85_s20, 0 }
   0xb   : > { %p676_p8 = por %p107_p5, %p106_p3  ;;  %p144_p9 = scmp.lt.s32.totalorder %s611_s14, 3 }
   0xc   : > { %s682_s22 = scalar_select %p88_p7, %s599_s11, %s90_s18  }
   0xd   : > { %p145_p10 = pnand %p399_p6, %p144_p9 }
   0xe   : > { %p174_p11 = scmp.lt.s32.totalorder (!%p145_p10), %s603_s12, 1  ;;  %s171_s4 = sand.u32 (!%p145_p10), 1, %s595_s10   ;;  %vm292_vm0 = vcmask (!%p145_p10), 261120  }
   0xf   : > { %148 = sbr.rel (%p145_p10) target bundleno = 292 (0x124), region = 28  ;;  %s400_s5 = sshll.u32 (!%p145_p10), %s171_s4, 3 }
  0x10   : > { %s406_s6 = sshll.u32 (!%p145_p10), %s603_s12, 7  ;;  %s173_s7 = scalar_lea.vmem (!%p145_p10), [#allocation2], %s400_s5 }
  0x11   : > { %s309_s8 = sshll.u32 (!%p145_p10), %s173_s7, 4  ;;  %s735_s18 = scalar_lea.hbm (!%p145_p10), %s784_s2, %s406_s6  ;;  %s737_s8 = int_to_ptr.vmem [resolvable:$true] %s309_s8 }
  0x12   : > { %s295_s20 = scalar_lea.sflag (!%p145_p10), [#allocation3], %s171_s4 }
  0x16   : > { %s175_s23 = scalar_select %p174_p11, %s603_s12, 1 }
  0x17   : > { %s613_s12 = smov [#allocation2]  }
  0x18   : > { %s410_s24 = sshll.u32 %s175_s23, 8  ;;  %s409_s28 = sshll.u32 %s175_s23, 4 }
  0x19   : > { %s689_s27 = scalar_lea.vmem %s783_s1, %s410_s24  ;;  %s708_s3 = scalar_lea.vmem %s782_s0, %s409_s28 }
  0x1a   : > { %v205_v0 = vld [vmem:[%s689_s27 + $0x80] sm:$0xff]  ;;  %v206_v1 = vld [vmem:[%s689_s27 + $0x88] sm:$0xff]  ;;  %v207_v5 = vld [vmem:[%s689_s27 + $0x90] sm:$0xff]  ;;  %s533_s23 = scalar_lea.vmem %s737_s8, 128  ;;  %s537_s24 = sshll.u32 %s613_s12, 4  ;;  %s538_s24 = int_to_ptr.vmem [resolvable:$false] %s537_s24 }
  0x1b   : > { %v189_v2 = vld [vmem:[%s689_s27] sm:$0xff]  ;;  %v446_v3 = vpack.c.bf16 %v206_v1, %v205_v0  ;;  %v190_v4 = vld [vmem:[%s689_s27 + $0x8] sm:$0xff]  ;;  %v208_v6 = vld [vmem:[%s689_s27 + $0x98] sm:$0xff]  ;;  %p534_p12 = scmp.ne.s32.totalorder %s737_s8, %s533_s23  ;;  %s539_s25 = scalar_lea.vmem %s538_s24, 256 }
  0x1c   : > { %v448_v7 = vpack.c.bf16 %v190_v4, %v189_v2  ;;  %v450_v8 = vpack.c.bf16 %v208_v6, %v207_v5  ;;  %v191_v9 = vld [vmem:[%s689_s27 + $0x10] sm:$0xff]  ;;  %v192_v10 = vld [vmem:[%s689_s27 + $0x18] sm:$0xff]  ;;  %v209_v11 = vld [vmem:[%s689_s27 + $0xa0] sm:$0xff]  ;;  %p540_p1 = scmp.lt.s32.totalorder %s737_s8, %s538_s24  ;;  %p541_p2 = scmp.lt.s32.totalorder %s539_s25, %s533_s23 }
  0x1d   : > { %447 = vmatprep.subr.bf16.mxu0 %v446_v3  ;;  %v210_v12 = vld [vmem:[%s689_s27 + $0xa8] sm:$0xff]  ;;  %v452_v13 = vpack.c.bf16 %v192_v10, %v191_v9  ;;  %v193_v15 = vld [vmem:[%s689_s27 + $0x20] sm:$0xff]  ;;  %v211_v17 = vld [vmem:[%s689_s27 + $0xb0] sm:$0xff]  ;;  %p535_p13 = pnand %p534_p12, %p669_p4 }
  0x1e   : > { %449 = vmatpush3.bf16.msra.mxu0 %v448_v7  ;;  %v454_v14 = vpack.c.bf16 %v210_v12, %v209_v11  ;;  %v194_v16 = vld [vmem:[%s689_s27 + $0x28] sm:$0xff]  ;;  %v212_v18 = vld [vmem:[%s689_s27 + $0xb8] sm:$0xff]  ;;  %v195_v21 = vld [vmem:[%s689_s27 + $0x30] sm:$0xff]  ;;  %p542_p3 = por %p541_p2, %p540_p1 }
  0x1f   : > { %451 = vmatprep.subr.bf16.mxu0 %v450_v8  ;;  %v456_v19 = vpack.c.bf16 %v194_v16, %v193_v15  ;;  %v458_v20 = vpack.c.bf16 %v212_v18, %v211_v17  ;;  %v196_v22 = vld [vmem:[%s689_s27 + $0x38] sm:$0xff]  ;;  %v213_v23 = vld [vmem:[%s689_s27 + $0xc0] sm:$0xff]  ;;  %v214_v24 = vld [vmem:[%s689_s27 + $0xc8] sm:$0xff]  ;;  %p536_p0 = pneg %p535_p13 }
  0x20   : > { %v188_v25 = vld [vmem:[%s708_s3 + $0x8] sm:$0xff]  ;;  %v460_v26 = vpack.c.bf16 %v196_v22, %v195_v21  ;;  %v462_v27 = vpack.c.bf16 %v214_v24, %v213_v23  ;;  %v197_v28 = vld [vmem:[%s689_s27 + $0x40] sm:$0xff]  ;;  %v215_v30 = vld [vmem:[%s689_s27 + $0xd0] sm:$0xff] }
  0x21   : > { %285 = vmatprep.mubr.f32.mxu0 %v188_v25  ;;  %v198_v29 = vld [vmem:[%s689_s27 + $0x48] sm:$0xff]  ;;  %v216_v31 = vld [vmem:[%s689_s27 + $0xd8] sm:$0xff]  ;;  %v199_v34 = vld [vmem:[%s689_s27 + $0x50] sm:$0xff]  ;;  %p543_p5 = pnand %p542_p3, %p536_p0 }
  0x22   : > { %453 = vmatpush3.bf16.msra.mxu0 %v452_v13  ;;  %v464_v32 = vpack.c.bf16 %v198_v29, %v197_v28  ;;  %v466_v33 = vpack.c.bf16 %v216_v31, %v215_v30  ;;  %v200_v35 = vld [vmem:[%s689_s27 + $0x58] sm:$0xff]  ;;  %v217_v36 = vld [vmem:[%s689_s27 + $0xe0] sm:$0xff]  ;;  %v218_v37 = vld [vmem:[%s689_s27 + $0xe8] sm:$0xff] }
  0x23   : > { %455 = vmatprep.subr.bf16.mxu0 %v454_v14  ;;  %v468_v38 = vpack.c.bf16 %v200_v35, %v199_v34  ;;  %v470_v39 = vpack.c.bf16 %v218_v37, %v217_v36  ;;  %v201_v40 = vld [vmem:[%s689_s27 + $0x60] sm:$0xff]  ;;  %v202_v41 = vld [vmem:[%s689_s27 + $0x68] sm:$0xff]  ;;  %v219_v42 = vld [vmem:[%s689_s27 + $0xf0] sm:$0xff] }
  0x24   : > { %v220_v43 = vld [vmem:[%s689_s27 + $0xf8] sm:$0xff]  ;;  %v472_v44 = vpack.c.bf16 %v202_v41, %v201_v40  ;;  %v203_v46 = vld [vmem:[%s689_s27 + $0x70] sm:$0xff]  ;;  %v187_v49 = vld [vmem:[%s708_s3] sm:$0xff] }
  0x25   : > { %v474_v45 = vpack.c.bf16 %v220_v43, %v219_v42  ;;  %v204_v47 = vld [vmem:[%s689_s27 + $0x78] sm:$0xff] }
  0x26   : > { %457 = vmatpush3.bf16.msra.mxu0 %v456_v19  ;;  %v476_v48 = vpack.c.bf16 %v204_v47, %v203_v46 }
  0x27   : > { %459 = vmatprep.subr.bf16.mxu0 %v458_v20 }
  0x2a   : > { %461 = vmatpush3.bf16.msra.mxu0 %v460_v26 }
  0x2b   : > { %463 = vmatprep.subr.bf16.mxu0 %v462_v27 }
  0x2e   : > { %465 = vmatpush3.bf16.msra.mxu0 %v464_v32 }
  0x2f   : > { %467 = vmatprep.subr.bf16.mxu0 %v466_v33 }
  0x32   : > { %469 = vmatpush3.bf16.msra.mxu0 %v468_v38 }
  0x33   : > { %471 = vmatprep.subr.bf16.mxu0 %v470_v39 }
  0x36   : > { %473 = vmatpush3.bf16.msra.mxu0 %v472_v44 }
  0x37   : > { %475 = vmatprep.subr.bf16.mxu0 %v474_v45 }
  0x3a   : > { %477 = vmatpush3.bf16.msra.mxu0 %v476_v48 }
  0x3d   : > { %286 = vmatmul.mubr.f32.vlgmr.msra.gmra.mrb[0].mxu0 %v187_v49 }
 0x110   : > { %v443_v50 = vpop.f32.mrb[0].mxu0 }
 0x111   : > { %v444_v51 = vpop.f32.mrb[1].mxu0 }
 0x112   : > { %v445_v52 = vadd.f32 %v444_v51, %v443_v50 }
 0x114   : > { %v291_v53 = vmul.f32 0.00390625, %v445_v52 }
 0x116   : > { %293 = vst.msk [vmem:[%s173_s7] sm:$0xff] %vm292_vm0, %v291_v53 }
 0x117   : > { %546 = shalt.err (!%p543_p5)
}
 0x118   : > { %s547_s26 = scalar_lea.hbm %s735_s18, 128  ;;  %s551_s29 = scalar_lea.hbm %s784_s2, 256 }
 0x119   : > { %p548_p6 = scmp.ne.s32.totalorder %s735_s18, %s547_s26  ;;  %p552_p10 = scmp.lt.u32.totalorder %s735_s18, %s784_s2 }
 0x11a   : > { %p553_p11 = scmp.lt.u32.totalorder %s551_s29, %s547_s26  ;;  %p555_p13 = scmp.lt.u32.totalorder %s547_s26, %s735_s18 }
 0x11b   : > { %p549_p7 = pnand %p548_p6, %p669_p4 }
 0x11c   : > { %p554_p12 = por %p553_p11, %p552_p10 }
 0x11d   : > { %p550_p9 = pneg %p549_p7 }
 0x11e   : > { %p556_p0 = por %p555_p13, %p554_p12 }
 0x120   : > { %p557_p1 = pnand %p556_p0, %p550_p9 }
 0x122   : > { %560 = shalt.err (!%p557_p1)
}
 0x123   : > { %478 = dma.vmem_to_hbm [thread:$0]  (%p669_p4), %s737_s8, 128, %s735_s18, %s295_s20  }
 0x124 PF: > { %p484_p2 = scmp.ge.s32.totalorder %s611_s14, 2  ;;  %s321_s4 = sand.u32 1, %s591_s9  }
 0x125   : > { %s322_s5 = scalar_lea.sflag [#allocation3], %s321_s4 }
 0x126   : > { %p481_p3 = pnand %p484_p2, %p676_p8 }
 0x128   : > { %586 = dma.done.wait (!%p481_p3), %s322_s5, 128  }
 0x129   : > { %588 = vsyncadd (!%p481_p3), %s322_s5, 4294967168  ;;  %s15_s14 = sadd.s32 1, %s611_s14   ;;  %s787_s9 = smov %s595_s10 }
 0x12a   : > { %p12_p5 = scmp.ge.s32.totalorder %s15_s14, 4   ;;  %s788_s10 = smov %s599_s11 }
 0x12b   : > { %s789_s11 = smov %s682_s22  ;;  %s790_s12 = smov %s607_s13 }
 0x12c   : > { %s791_s13 = smov %s793_s17  ;;  %14 = sbr.rel (!%p12_p5) target bundleno = 4 (0x4), region = 66 }
 0x133   :  { %327 = vsyncpa [#allocation3], 1 }
 0x134   :  { %329 = vsyncpa [#allocation3 + $0x1], 1 }

</bundles_post_ra>
